<compile_context>
chip_gen: v6e
topology: v6e:2x2x1
jax: 0.10.0
libtpu: 0.0.40
codegen_flags: <defaults>
</compile_context>

<pallas_src>
import functools

import jax
import jax.numpy as jnp
from jax.experimental import pallas as pl
from jax.experimental.pallas import tpu as pltpu


def _round_up(v, m):
    return ((v + m - 1) // m) * m


def _vmem_capacity_bytes():
    # Trace-time hardware query; fall back to the smallest (v7x) VMEM if the
    # query is unavailable so the derived limits are always safe.
    try:
        return int(pltpu.get_tpu_info().vmem_capacity_bytes)
    except Exception:
        return 64 * 1024 * 1024


def _tnsce_kernel(x_ref, t_ref, out_ref, *, eps, nan_val, n_rows, tile_rows):
    i = pl.program_id(0)

    x = x_ref[...].astype(jnp.float32)
    # torch.nan_to_num(x, nan=nan_val): NaN -> nan_val, +/-inf -> finite max/min.
    x = jnp.nan_to_num(x, nan=nan_val)

    c = x.shape[-1]
    mean = jnp.mean(x, axis=-1, keepdims=True)
    centered = x - mean
    # torch.std is unbiased (divides by C-1) by default.
    var = jnp.sum(centered * centered, axis=-1, keepdims=True) * jnp.float32(
        1.0 / (c - 1))
    std = jnp.sqrt(var) + jnp.float32(eps)

    # Fold temperature (=2) into the per-row scale: one exact per-row divide,
    # one multiply per element (instead of divide + extra *0.5 pass).
    scale = jnp.float32(0.5) / std
    z = centered * scale
    # NOTE: the reference applies a second nan_to_num to (x-mean)/std.  Since
    # x is finite here and std >= eps > 0, z can never be NaN; only inputs of
    # magnitude >~3e26 (with eps=1e-12) could overflow to +/-inf, which we
    # deliberately do not clamp to save ~5 VPU ops/element.

    # Numerically stable log-softmax pieces (log_probs never materialized).
    m = jnp.max(z, axis=-1, keepdims=True)
    shifted = z - m
    lse = jnp.log(jnp.sum(jnp.exp(shifted), axis=-1, keepdims=True))

    t = t_ref[...].astype(jnp.float32)
    sum_t = jnp.sum(t, axis=-1, keepdims=True)
    sum_tz = jnp.sum(t * shifted, axis=-1, keepdims=True)
    # sum(-t * log_probs) = sum(-t * (shifted - lse)) = lse*sum(t) - sum(t*shifted)
    row_loss = lse * sum_t - sum_tz  # (tile_rows, 1)

    # Mask rows of a ragged last block (their VMEM contents are undefined).
    row_idx = i * tile_rows + jax.lax.broadcasted_iota(jnp.int32, (tile_rows, 1), 0)
    row_loss = jnp.where(row_idx < n_rows, row_loss, 0.0)

    block_sum = jnp.sum(row_loss)
    # Lane-dense, fully (8,128)-aligned per-block output slab.
    out_ref[...] = jnp.full((1, 8, 128), block_sum, dtype=jnp.float32)


def temp_norm_soft_cross_entropy(x, target, *, eps=1e-12,
                                 nan_replacement_value=0.0, tile_rows=None,
                                 vmem_budget_bytes=None, vmem_limit_bytes=None,
                                 buffer_count=2):
    assert x.shape == target.shape
    n_cols = x.shape[-1]
    if n_cols < 2:
        # Unbiased std divides by (C-1); C==1 is degenerate in the reference
        # (std is NaN, every normalized value becomes nan_replacement_value).
        raise ValueError("TempNormSoftCrossEntropy requires at least 2 classes")

    x2 = x.reshape(-1, n_cols)
    t2 = target.reshape(-1, n_cols)
    n_rows = x2.shape[0]

    # Chip-derived VMEM budget/limit (v5e/v6e: 128 MiB, v7x: 64 MiB).
    cap = _vmem_capacity_bytes()
    if vmem_budget_bytes is None:
        vmem_budget_bytes = int(cap * 0.50)
    if vmem_limit_bytes is None:
        vmem_limit_bytes = int(cap * 0.75)

    itemsize = jnp.dtype(x2.dtype).itemsize
    sub = {4: 8, 2: 16, 1: 32}.get(itemsize, 8)  # sublane quantum per dtype

    auto_sized = tile_rows is None
    if auto_sized:
        # Per-step VMEM footprint per row:
        #   2 inputs x buffer_count pipeline buffers x itemsize
        #   + ~6 f32 tile-sized temporaries in the body
        #     (x_f32, centered, z/shifted, exp, t_f32, t*shifted).
        bytes_per_row = n_cols * (2 * buffer_count * itemsize + 6 * 4)
        if sub * bytes_per_row > vmem_limit_bytes:
            # TODO(synk): C-tiled online-softmax path for very wide class axes.
            raise NotImplementedError(
                f"class axis too wide for a single row tile on this chip "
                f"(C={n_cols}, needs {sub * bytes_per_row} B > "
                f"{vmem_limit_bytes} B VMEM limit)")
        tile_rows = max(sub, (vmem_budget_bytes // bytes_per_row) // sub * sub)
        # v7x has 2 TensorCores and the ("parallel",) grid axis is the only
        # thing sharding work across them: aim for at least 2 blocks.
        if n_rows > sub:
            tile_rows = min(tile_rows, _round_up(pl.cdiv(n_rows, 2), sub))

    tile_rows = min(tile_rows, _round_up(n_rows, sub))
    tile_rows = max(sub, _round_up(tile_rows, sub))
    n_blocks = pl.cdiv(n_rows, tile_rows)

    if auto_sized and n_blocks > 2 and n_blocks % 2:
        # Best-effort: prefer an even block count for TC load balance.
        cand = max(sub, _round_up(pl.cdiv(n_rows, n_blocks + 1), sub))
        if pl.cdiv(n_rows, cand) % 2 == 0:
            tile_rows = cand
            n_blocks = pl.cdiv(n_rows, cand)

    kernel = functools.partial(
        _tnsce_kernel,
        eps=eps,
        nan_val=nan_replacement_value,
        n_rows=n_rows,
        tile_rows=tile_rows,
    )

    spec_kwargs = {}
    if buffer_count != 2:
        spec_kwargs = dict(pipeline_mode=pl.Buffered(buffer_count))

    cost = pl.CostEstimate(
        flops=14 * n_rows * n_cols,
        transcendentals=n_rows * n_cols,
        bytes_accessed=2 * n_rows * n_cols * itemsize + n_blocks * 8 * 128 * 4,
    )

    partials = pl.pallas_call(
        kernel,
        out_shape=jax.ShapeDtypeStruct((n_blocks, 8, 128), jnp.float32),
        grid_spec=pltpu.PrefetchScalarGridSpec(
            num_scalar_prefetch=0,
            grid=(n_blocks,),
            in_specs=[
                pl.BlockSpec((tile_rows, n_cols), lambda i: (i, 0), **spec_kwargs),
                pl.BlockSpec((tile_rows, n_cols), lambda i: (i, 0), **spec_kwargs),
            ],
            out_specs=pl.BlockSpec((1, 8, 128), lambda i: (i, 0, 0)),
        ),
        compiler_params=pltpu.CompilerParams(
            dimension_semantics=("parallel",),
            vmem_limit_bytes=vmem_limit_bytes),
        cost_estimate=cost,
    )(x2, t2)

    # Tiny final reduction (and the mean over rows) in f32 in the wrapper.
    return jnp.sum(partials[:, 0, 0]) / jnp.float32(n_rows)


def _reference(x, target, eps=1e-12, nan_val=0.0):
    x = jnp.nan_to_num(x, nan=nan_val).astype(jnp.float32)
    mean = x.mean(axis=-1, keepdims=True)
    std = x.std(axis=-1, keepdims=True, ddof=1) + eps
    xn = jnp.nan_to_num((x - mean) / std, nan=nan_val)
    logp = jax.nn.log_softmax(xn / 2.0, axis=-1)
    loss = jnp.sum(-target * logp, axis=-1)
    return loss.mean()


if __name__ == "__main__":
    key = jax.random.PRNGKey(0)
    kx, kt, kx2, kt2 = jax.random.split(key, 4)

    # Test 1: ragged row count (20, not a multiple of 8), C=128, NaNs in x.
    N, C = 20, 128
    x = jax.random.normal(kx, (N, C), dtype=jnp.float32) * 3.0
    x = x.at[3, 17].set(jnp.nan).at[11, 0].set(jnp.nan)
    target = jax.nn.softmax(jax.random.normal(kt, (N, C), dtype=jnp.float32),
                            axis=-1)
    ref = _reference(x, target)

    # Auto-sized path (>= 2 blocks so both v7x TensorCores get work).
    loss = jax.block_until_ready(temp_norm_soft_cross_entropy(x, target))
    assert jnp.allclose(loss, ref, atol=1e-5, rtol=1e-5), (loss, ref)

    # Forced small tile: 3 blocks, ragged last block, in-kernel masking.
    loss2 = jax.block_until_ready(
        temp_norm_soft_cross_entropy(x, target, tile_rows=8))
    assert jnp.allclose(loss2, ref, atol=1e-5, rtol=1e-5), (loss2, ref)

    # Test 2: 3-D input (leading dims flattened), wider C, ragged row count.
    B, S, C2 = 2, 5, 384
    x3 = jax.random.normal(kx2, (B, S, C2), dtype=jnp.float32) * 2.0
    t3 = jax.nn.softmax(jax.random.normal(kt2, (B, S, C2), dtype=jnp.float32),
                        axis=-1)
    ref3 = _reference(x3, t3)
    loss3 = jax.block_until_ready(temp_norm_soft_cross_entropy(x3, t3))
    assert jnp.allclose(loss3, ref3, atol=1e-5, rtol=1e-5), (loss3, ref3)

    print("KERNEL_OK")
</pallas_src>

<mosaic_0001>
module attributes {stable_mosaic.version = 11 : i64} {
  func.func @_tnsce_kernel(%arg0: i32, %arg1: memref<16x128xf32, #tpu.memory_space<vmem>>, %arg2: memref<16x128xf32, #tpu.memory_space<vmem>>, %arg3: memref<1x8x128xf32, #tpu.memory_space<vmem>>) attributes {dimension_semantics = [#tpu.dimension_semantics<parallel>], iteration_bounds = array<i64: 2>, scalar_prefetch = 0 : i64, scratch_operands = 0 : i64, tpu.core_type = #tpu.core_type<tc>, window_params = [{transform_indices = @transform_0, window_bounds = array<i64: 16, 128>}, {transform_indices = @transform_1, window_bounds = array<i64: 16, 128>}, {transform_indices = @transform_2, window_bounds = array<i64: 1, 8, 128>}]} {
    %c0 = arith.constant 0 : index
    %c0_0 = arith.constant 0 : index
    %0 = vector.load %arg1[%c0, %c0_0] : memref<16x128xf32, #tpu.memory_space<vmem>>, vector<16x128xf32>
    %cst = arith.constant 0.000000e+00 : f32
    %1 = arith.cmpf one, %0, %0 : vector<16x128xf32>
    %2 = vector.broadcast %cst : f32 to vector<16x128xf32>
    %3 = arith.select %1, %2, %0 : vector<16x128xi1>, vector<16x128xf32>
    %cst_1 = arith.constant 0x7F800000 : f32
    %4 = vector.broadcast %cst_1 : f32 to vector<16x128xf32>
    %5 = arith.cmpf oeq, %3, %4 : vector<16x128xf32>
    %cst_2 = arith.constant 3.40282347E+38 : f32
    %6 = vector.broadcast %cst_2 : f32 to vector<16x128xf32>
    %7 = arith.select %5, %6, %3 : vector<16x128xi1>, vector<16x128xf32>
    %cst_3 = arith.constant 0xFF800000 : f32
    %8 = vector.broadcast %cst_3 : f32 to vector<16x128xf32>
    %9 = arith.cmpf oeq, %7, %8 : vector<16x128xf32>
    %cst_4 = arith.constant -3.40282347E+38 : f32
    %10 = vector.broadcast %cst_4 : f32 to vector<16x128xf32>
    %11 = arith.select %9, %10, %7 : vector<16x128xi1>, vector<16x128xf32>
    %cst_5 = arith.constant dense<0.000000e+00> : vector<16xf32>
    %12 = vector.multi_reduction <add>, %11, %cst_5 [1] : vector<16x128xf32> to vector<16xf32>
    %13 = vector.shape_cast %12 : vector<16xf32> to vector<16x1xf32>
    %cst_6 = arith.constant 1.280000e+02 : f32
    %14 = vector.broadcast %cst_6 : f32 to vector<16x1xf32>
    %15 = arith.divf %13, %14 : vector<16x1xf32>
    %16 = vector.broadcast %15 : vector<16x1xf32> to vector<16x128xf32>
    %17 = arith.subf %11, %16 : vector<16x128xf32>
    %18 = arith.mulf %17, %17 : vector<16x128xf32>
    %cst_7 = arith.constant dense<0.000000e+00> : vector<16xf32>
    %19 = vector.multi_reduction <add>, %18, %cst_7 [1] : vector<16x128xf32> to vector<16xf32>
    %20 = vector.shape_cast %19 : vector<16xf32> to vector<16x1xf32>
    %cst_8 = arith.constant 0.00787401571 : f32
    %21 = vector.broadcast %cst_8 : f32 to vector<16x1xf32>
    %22 = arith.mulf %20, %21 : vector<16x1xf32>
    %23 = math.sqrt %22 : vector<16x1xf32>
    %cst_9 = arith.constant 9.99999996E-13 : f32
    %24 = vector.broadcast %cst_9 : f32 to vector<16x1xf32>
    %25 = arith.addf %23, %24 : vector<16x1xf32>
    %cst_10 = arith.constant 5.000000e-01 : f32
    %26 = vector.broadcast %cst_10 : f32 to vector<16x1xf32>
    %27 = arith.divf %26, %25 : vector<16x1xf32>
    %28 = vector.broadcast %27 : vector<16x1xf32> to vector<16x128xf32>
    %29 = arith.mulf %17, %28 : vector<16x128xf32>
    %cst_11 = arith.constant dense<0xFF800000> : vector<16xf32>
    %30 = vector.multi_reduction <maximumf>, %29, %cst_11 [1] : vector<16x128xf32> to vector<16xf32>
    %31 = vector.shape_cast %30 : vector<16xf32> to vector<16x1xf32>
    %32 = vector.broadcast %31 : vector<16x1xf32> to vector<16x128xf32>
    %33 = arith.subf %29, %32 : vector<16x128xf32>
    %34 = math.exp %33 : vector<16x128xf32>
    %cst_12 = arith.constant dense<0.000000e+00> : vector<16xf32>
    %35 = vector.multi_reduction <add>, %34, %cst_12 [1] : vector<16x128xf32> to vector<16xf32>
    %36 = vector.shape_cast %35 : vector<16xf32> to vector<16x1xf32>
    %37 = math.log %36 : vector<16x1xf32>
    %c0_13 = arith.constant 0 : index
    %c0_14 = arith.constant 0 : index
    %38 = vector.load %arg2[%c0_13, %c0_14] : memref<16x128xf32, #tpu.memory_space<vmem>>, vector<16x128xf32>
    %cst_15 = arith.constant dense<0.000000e+00> : vector<16xf32>
    %39 = vector.multi_reduction <add>, %38, %cst_15 [1] : vector<16x128xf32> to vector<16xf32>
    %40 = vector.shape_cast %39 : vector<16xf32> to vector<16x1xf32>
    %41 = arith.mulf %38, %33 : vector<16x128xf32>
    %cst_16 = arith.constant dense<0.000000e+00> : vector<16xf32>
    %42 = vector.multi_reduction <add>, %41, %cst_16 [1] : vector<16x128xf32> to vector<16xf32>
    %43 = vector.shape_cast %42 : vector<16xf32> to vector<16x1xf32>
    %44 = arith.mulf %37, %40 : vector<16x1xf32>
    %45 = arith.subf %44, %43 : vector<16x1xf32>
    %c16_i32 = arith.constant 16 : i32
    %46 = arith.muli %arg0, %c16_i32 : i32
    %47 = tpu.iota {dimensions = array<i32: 0>} : vector<16x1xi32>
    %48 = vector.broadcast %46 : i32 to vector<16x1xi32>
    %49 = arith.addi %48, %47 : vector<16x1xi32>
    %c20_i32 = arith.constant 20 : i32
    %50 = vector.broadcast %c20_i32 : i32 to vector<16x1xi32>
    %51 = arith.cmpi slt, %49, %50 : vector<16x1xi32>
    %cst_17 = arith.constant 0.000000e+00 : f32
    %52 = vector.broadcast %cst_17 : f32 to vector<16x1xf32>
    %53 = arith.select %51, %45, %52 : vector<16x1xi1>, vector<16x1xf32>
    %54 = vector.shape_cast %53 : vector<16x1xf32> to vector<1x16x1xf32>
    %cst_18 = arith.constant dense<0.000000e+00> : vector<1xf32>
    %55 = vector.multi_reduction <add>, %54, %cst_18 [1, 2] : vector<1x16x1xf32> to vector<1xf32>
    %56 = vector.shape_cast %55 : vector<1xf32> to vector<1x1x1xf32>
    %57 = vector.extract %56[0, 0, 0] : f32 from vector<1x1x1xf32>
    %58 = vector.broadcast %57 : f32 to vector<1x8x128xf32>
    %c0_19 = arith.constant 0 : index
    %c0_20 = arith.constant 0 : index
    %c0_21 = arith.constant 0 : index
    %59 = vector.load %arg3[%c0_19, %c0_20, %c0_21] : memref<1x8x128xf32, #tpu.memory_space<vmem>>, vector<1x8x128xf32>
    tpu.vector_store %arg3[%c0_19, %c0_20, %c0_21], %58 {strides = array<i32>} : memref<1x8x128xf32, #tpu.memory_space<vmem>>, vector<1x8x128xf32>,
    return
  }
  func.func @transform_0(%arg0: i32) -> (i32, i32) {
    %c0_i32 = arith.constant 0 : i32
    %c0_i32_0 = arith.constant 0 : i32
    return %arg0, %c0_i32 : i32, i32
  }
  func.func @transform_1(%arg0: i32) -> (i32, i32) {
    %c0_i32 = arith.constant 0 : i32
    %c0_i32_0 = arith.constant 0 : i32
    return %arg0, %c0_i32 : i32, i32
  }
  func.func @transform_2(%arg0: i32) -> (i32, i32, i32) {
    %c0_i32 = arith.constant 0 : i32
    %c0_i32_0 = arith.constant 0 : i32
    %c0_i32_1 = arith.constant 0 : i32
    return %arg0, %c0_i32, %c0_i32_0 : i32, i32, i32
  }
}

</mosaic_0001>

<bundles_post_ra>
// kernel: tpu_custom_call.1
= control target key start
LH: loop header
LB: loop body
LE: loop exit
PB: predicated region body
PF: predicated region fallthrough
CT: control target
= control target key end

     0   :  { %7 = vsyncpa [#allocation3], 0  ;;  %s887_s0 = inlined_call_operand.hbm [shape: f32[20,128], index: 0, kind: input, shape index: {}]   ;;  %s888_s1 = inlined_call_operand.hbm [shape: f32[20,128], index: 1, kind: input, shape index: {}]   ;;  %s889_s2 = inlined_call_operand.hbm [shape: f32[2,8,128], index: 2, kind: output, shape index: {}]  }
   0x1   :  { %9 = vsyncpa [#allocation3 + $0x1], 0 }
   0x2   :  { %10 = vsyncpa [#allocation6], 0 }
   0x3   :  { %12 = vsyncpa [#allocation6 + $0x1], 0 }
   0x4   :  { %13 = vsyncpa [#allocation4], 0 }
   0x5   :  { %15 = vsyncpa [#allocation4 + $0x1], 0  ;;  %s679_s9 = smov 0   ;;  %s681_s10 = smov 0  }
   0x6   :  { %s683_s11 = smov 0   ;;  %s685_s12 = smov 0  }
   0x7 LB: > { %s700_s13 = sadd.s32 4294967295, %s655_s12   ;;  %s444_s14 = sadd.s32 4294967294, %s655_s12   ;;  %s655_s12 = sphi %s685_s12, %s902_s12   ;;  %s651_s11 = sphi %s683_s11, %s901_s11   ;;  %s647_s10 = sphi %s681_s10, %s900_s10   ;;  %s643_s9 = sphi %s679_s9, %s899_s9  }
   0x8   : > { %s704_s15 = sadd.s32 1, %s655_s12   ;;  %s28_s16 = sadd.s32 1, %s651_s11 }
   0x9   : > { %s25_s17 = ssub.s32 %s655_s12, %s704_s15  ;;  %p35_p0 = scmp.ne.s32.totalorder %s651_s11, %s647_s10 }
   0xa   : > { %p26_p1 = scmp.eq.s32.totalorder %s25_s17, 0  ;;  %p36_p2 = scmp.eq.s32.totalorder %s655_s12, 0 }
   0xb   : > { %p41_p3 = scmp.ne.s32.totalorder %s647_s10, %s643_s9  ;;  %p42_p4 = scmp.eq.s32.totalorder %s700_s13, 0 }
   0xc   : > { %s716_s18 = scalar_select %p26_p1, %s651_s11, %s28_s16  }
   0xd   : > { %p718_p5 = por %p36_p2, %p35_p0  ;;  %p722_p6 = por %p42_p4, %p41_p3 }
   0xe   : > { %p91_p7 = scmp.eq.s32.totalorder %s700_s13, 1  ;;  %p97_p8 = scmp.eq.s32.totalorder %s444_s14, 1 }
   0xf   : > { %p890_p11 = scmp.ge.s32.totalorder %s655_s12, 2 }
  0x10   : > { %p727_p9 = por %p91_p7, %p35_p0  ;;  %p731_p10 = por %p97_p8, %p41_p3 }
  0x11   : > { %113 = sbr.rel (%p890_p11) target bundleno = 86 (0x56), region = 16 }
  0x12   : > { %s894_s21 = scalar_select %p727_p9, 1, 0 }
  0x13   : > { %s895_s22 = scalar_select %p731_p10, 1, 0 }
  0x16   : > { %116 = sbr.rel (!%p718_p5) target bundleno = 54 (0x36), region = 20  ;;  %s117_s23 = sand.u32 (%p718_p5), 1, %s651_s11  }
  0x17   : > { %s448_s24 = sshll.u32 (%p718_p5), %s655_s12, 1  ;;  %s447_s25 = sshll.u32 (%p718_p5), %s117_s23, 4 }
  0x18   : > { %s123_s26 = ssub.s32 (%p718_p5), 3, %s448_s24  ;;  %s745_s29 = scalar_lea.sflag (%p718_p5), [#allocation3], %s117_s23 }
  0x19   : > { %p124_p12 = scmp.lt.s32.totalorder (%p718_p5), %s123_s26, 2  ;;  %s121_s30 = scalar_lea.vmem (%p718_p5), [#allocation2], %s447_s25 }
  0x1b   : > { %s904_s26 = smov (!%p124_p12, %s123_s26), 2 }
  0x1c   : > { %s742_s27 = sshll.u32 %s904_s26, 7 }
  0x1d   : > { %s128_s28 = ssub.s32 256, %s742_s27 }
  0x1e   : > { %129 = vsyncadd %s745_s29, %s128_s28  ;;  %p450_p13 = scmp.ne.s32.totalorder %s742_s27, 0  ;;  %s470_s3 = sshll.u32 %s655_s12, 8 }
  0x1f   : > { %s753_s6 = scalar_lea.hbm %s887_s0, %s470_s3  ;;  %s134_s7 = sshll.u32 %s121_s30, 4  ;;  %s755_s7 = int_to_ptr.vmem [resolvable:$true] %s134_s7 }
  0x20   : > { %s535_s8 = scalar_lea.hbm %s753_s6, %s742_s27  ;;  %s539_s17 = scalar_lea.hbm %s887_s0, 384 }
  0x21   : > { %p536_p0 = scmp.ne.s32.totalorder %s753_s6, %s535_s8  ;;  %p540_p3 = scmp.lt.s32.totalorder %s753_s6, %s887_s0 }
  0x22   : > { %p541_p4 = scmp.lt.s32.totalorder %s539_s17, %s535_s8 }
  0x23   : > { %p537_p1 = pnand %p536_p0, %p450_p13 }
  0x24   : > { %p542_p7 = por %p541_p4, %p540_p3 }
  0x25   : > { %p538_p2 = pneg %p537_p1 }
  0x27   : > { %p543_p8 = pnand %p542_p7, %p538_p2 }
  0x29   : > { %546 = shalt.err (!%p543_p8)
}
  0x2a   : > { %s547_s25 = scalar_lea.vmem %s755_s7, %s742_s27  ;;  %s657_s26 = smov [#allocation2]  }
  0x2b   : > { %p548_p12 = scmp.ne.s32.totalorder %s755_s7, %s547_s25  ;;  %s551_s28 = sshll.u32 %s657_s26, 4  ;;  %s552_s28 = int_to_ptr.vmem [resolvable:$false] %s551_s28 }
  0x2c   : > { %s553_s30 = scalar_lea.vmem %s552_s28, 512  ;;  %p554_p11 = scmp.lt.s32.totalorder %s755_s7, %s552_s28 }
  0x2d   : > { %p549_p0 = pnand %p548_p12, %p450_p13  ;;  %p555_p10 = scmp.lt.s32.totalorder %s553_s30, %s547_s25 }
  0x2f   : > { %p550_p1 = pneg %p549_p0  ;;  %p556_p9 = por %p555_p10, %p554_p11 }
  0x31   : > { %p557_p3 = pnand %p556_p9, %p550_p1 }
  0x33   : > { %560 = shalt.err (!%p557_p3)
}
  0x34   : > { %s658_s3 = smov 128   ;;  %s659_s4 = smov 8  }
  0x35   : > { %140 = dma.hbm_to_vmem [thread:$0]  (%p450_p13), %s753_s6, %s742_s27, %s755_s7, %s745_s29, %s658_s3, %s658_s3, %s659_s4  }
  0x36 PF: > { %143 = sbr.rel (!%p718_p5) target bundleno = 86 (0x56), region = 24  ;;  %s144_s5 = sand.u32 (%p718_p5), 1, %s651_s11  }
  0x37   : > { %s455_s8 = sshll.u32 (%p718_p5), %s655_s12, 1  ;;  %s454_s14 = sshll.u32 (%p718_p5), %s144_s5, 4 }
  0x38   : > { %s150_s16 = ssub.s32 (%p718_p5), 3, %s455_s8  ;;  %s788_s24 = scalar_lea.sflag (%p718_p5), [#allocation6], %s144_s5 }
  0x39   : > { %p151_p9 = scmp.lt.s32.totalorder (%p718_p5), %s150_s16, 2  ;;  %s148_s27 = scalar_lea.vmem (%p718_p5), [#allocation5], %s454_s14 }
  0x3b   : > { %s906_s16 = smov (!%p151_p9, %s150_s16), 2 }
  0x3c   : > { %s785_s17 = sshll.u32 %s906_s16, 7 }
  0x3d   : > { %s155_s23 = ssub.s32 256, %s785_s17 }
  0x3e   : > { %156 = vsyncadd %s788_s24, %s155_s23  ;;  %p457_p5 = scmp.ne.s32.totalorder %s785_s17, 0  ;;  %s471_s19 = sshll.u32 %s655_s12, 8 }
  0x3f   : > { %s796_s7 = scalar_lea.hbm %s888_s1, %s471_s19  ;;  %s161_s25 = sshll.u32 %s148_s27, 4  ;;  %s798_s25 = int_to_ptr.vmem [resolvable:$true] %s161_s25 }
  0x40   : > { %s561_s26 = scalar_lea.hbm %s796_s7, %s785_s17  ;;  %s565_s3 = scalar_lea.hbm %s888_s1, 384 }
  0x41   : > { %p562_p10 = scmp.ne.s32.totalorder %s796_s7, %s561_s26  ;;  %p566_p2 = scmp.lt.s32.totalorder %s796_s7, %s888_s1 }
  0x42   : > { %p567_p4 = scmp.lt.s32.totalorder %s565_s3, %s561_s26 }
  0x43   : > { %p563_p11 = pnand %p562_p10, %p457_p5 }
  0x44   : > { %p568_p7 = por %p567_p4, %p566_p2 }
  0x45   : > { %p564_p13 = pneg %p563_p11 }
  0x47   : > { %p569_p8 = pnand %p568_p7, %p564_p13 }
  0x49   : > { %572 = shalt.err (!%p569_p8)
}
  0x4a   : > { %s573_s8 = scalar_lea.vmem %s798_s25, %s785_s17  ;;  %s660_s14 = smov [#allocation5]  }
  0x4b   : > { %p574_p12 = scmp.ne.s32.totalorder %s798_s25, %s573_s8  ;;  %s577_s16 = sshll.u32 %s660_s14, 4  ;;  %s578_s16 = int_to_ptr.vmem [resolvable:$false] %s577_s16 }
  0x4c   : > { %s579_s23 = scalar_lea.vmem %s578_s16, 512  ;;  %p580_p3 = scmp.lt.s32.totalorder %s798_s25, %s578_s16 }
  0x4d   : > { %p575_p0 = pnand %p574_p12, %p457_p5  ;;  %p581_p9 = scmp.lt.s32.totalorder %s579_s23, %s573_s8 }
  0x4f   : > { %p576_p1 = pneg %p575_p0  ;;  %p582_p10 = por %p581_p9, %p580_p3 }
  0x51   : > { %p583_p11 = pnand %p582_p10, %p576_p1 }
  0x53   : > { %586 = shalt.err (!%p583_p11)
}
  0x54   : > { %s661_s27 = smov 128   ;;  %s662_s19 = smov 8  }
  0x55   : > { %167 = dma.hbm_to_vmem [thread:$0]  (%p457_p5), %s796_s7, %s785_s17, %s798_s25, %s788_s24, %s661_s27, %s661_s27, %s662_s19  }
  0x56 PF: > { %p461_p13 = scmp.ge.s32.totalorder %s655_s12, 1  ;;  %p169_p2 = scmp.lt.s32.totalorder %s655_s12, 3 }
  0x58   : > { %p170_p4 = pnand %p461_p13, %p169_p2 }
  0x59   : > { %s827_s29 = sand.u32 (!%p170_p4), 1, %s647_s10  }
  0x5a   : > { %173 = sbr.rel (%p170_p4) target bundleno = 963 (0x3c3), region = 28  ;;  %s462_s6 = sshll.u32 (!%p170_p4), %s827_s29, 4 }
  0x5b   : > { %s176_s26 = scalar_lea.sflag (!%p170_p4), [#allocation3], %s827_s29  ;;  %s179_s28 = scalar_lea.vmem (!%p170_p4), [#allocation2], %s462_s6 }
  0x5f   : > { %630 = dma.done.wait (%p722_p6), %s176_s26, 256  }
  0x60   : > { %632 = vsyncadd (%p722_p6), %s176_s26, 4294967040  ;;  %s185_s17 = scalar_lea.sflag [#allocation6], %s827_s29  ;;  %s836_s24 = scalar_lea.vmem [#allocation5], %s462_s6 }
  0x61   : > { %634 = dma.done.wait (%p722_p6), %s185_s17, 256  }
  0x62   : > { %636 = vsyncadd (%p722_p6), %s185_s17, 4294967040  ;;  %v224_v0 = vld [vmem:[%s179_s28] sm:$0xff]  ;;  %v225_v1 = vld [vmem:[%s179_s28 + $0x8] sm:$0xff]  ;;  %v312_v52 = vlaneseq  ;;  %s465_s20 = sshll.u32 %s700_s13, 4  ;;  %vm322_vm12 = vcmask 7168   ;;  %s464_s7 = sshll.u32 %s827_s29, 3 }
  0x63   : > { %vm226_vm0 = vcmp.ne.f32.partialorder %v224_v0, %v224_v0  ;;  %vm227_vm1 = vcmp.ne.f32.partialorder %v225_v1, %v225_v1  ;;  %v295_v46 = vld [vmem:[%s836_s24] sm:$0xff]  ;;  %v296_v48 = vld [vmem:[%s836_s24 + $0x8] sm:$0xff]  ;;  %v315_v55 = vstv %s465_s20  ;;  %s213_s25 = scalar_lea.vmem [#allocation7], %s464_s7  ;;  %s467_s3 = sshll.u32 %s700_s13, 7 }
  0x64   : > { %v228_v2 = vsel %vm226_vm0, 0.0, %v224_v0  ;;  %v229_v3 = vsel %vm227_vm1, 0.0, %v225_v1  ;;  %v313_v54 = vshrl.u32 %v312_v52, 7  ;;  %s351_s30 = sshll.u32 %s213_s25, 4  ;;  %s349_s14 = scalar_lea.hbm %s889_s2, %s467_s3  ;;  %s847_s30 = int_to_ptr.vmem [resolvable:$true] %s351_s30 }
  0x65   : > { %vm230_vm2 = vcmp.eq.f32.partialorder %v228_v2, inf  ;;  %vm231_vm3 = vcmp.eq.f32.partialorder %v229_v3, inf  ;;  %s338_s16 = scalar_lea.sflag [#allocation4], %s827_s29  ;;  %s587_s23 = scalar_lea.vmem %s847_s30, 128 }
  0x66   : > { %v232_v4 = vsel %vm230_vm2, 3.4028235e+38, %v228_v2  ;;  %v233_v5 = vsel %vm231_vm3, 3.4028235e+38, %v229_v3  ;;  %v314_v57 = vadd.s32 8, %v313_v54  ;;  %v316_v60 = vadd.s32 %v315_v55, %v313_v54  ;;  %p588_p6 = scmp.ne.s32.totalorder %s847_s30, %s587_s23  ;;  %p896_p5 = scmp.ne.s32.totalorder %s894_s21, 0 }
  0x67   : > { %vm234_vm4 = vcmp.eq.f32.partialorder %v232_v4, -inf  ;;  %vm235_vm5 = vcmp.eq.f32.partialorder %v233_v5, -inf  ;;  %s663_s27 = smov [#allocation7]  }
  0x68   : > { %v236_v6 = vsel %vm234_vm4, -3.4028235e+38, %v232_v4  ;;  %v237_v7 = vsel %vm235_vm5, -3.4028235e+38, %v233_v5  ;;  %v317_v0 = vadd.s32 %v315_v55, %v314_v57  ;;  %vm318_vm10 = vcmp.lt.s32.totalorder %v316_v60, 20  ;;  %p589_p7 = pnand %p588_p6, %p896_p5  ;;  %s591_s13 = sshll.u32 %s663_s27, 4  ;;  %s592_s13 = int_to_ptr.vmem [resolvable:$false] %s591_s13 }
  0x69   : > { %238 = vadd.xlane.f32.xlu0 %v236_v6  ;;  %s593_s19 = scalar_lea.vmem %s592_s13, 256  ;;  %p594_p12 = scmp.lt.s32.totalorder %s847_s30, %s592_s13 }
  0x6a   : > { %vm319_vm11 = vcmp.lt.s32.totalorder %v317_v0, 20  ;;  %p590_p8 = pneg %p589_p7  ;;  %p595_p0 = scmp.lt.s32.totalorder %s593_s19, %s587_s23 }
  0x6c   : > { %p596_p1 = por %p595_p0, %p594_p12 }
  0x6d   : > { %240 = vadd.xlane.f32.xlu0 %v237_v7 }
  0x6e   : > { %p597_p3 = pnand %p596_p1, %p590_p8 }
  0xf2   : > { %v239_v8 = vpop.xlane.xlu0 %238 }
  0xf3   : > { %v243_v9 = vmul.f32 0.0078125, %v239_v8 }
  0xf5   : > { %v245_v10 = vsub.f32 %v236_v6, %v243_v9 }
  0xf6   : > { %v241_v11 = vpop.xlane.xlu0 %240 }
  0xf7   : > { %v244_v12 = vmul.f32 0.0078125, %v241_v11  ;;  %v247_v13 = vmul.f32 %v245_v10, %v245_v10 }
  0xf9   : > { %v246_v14 = vsub.f32 %v237_v7, %v244_v12  ;;  %249 = vadd.xlane.f32.xlu1 %v247_v13 }
  0xfb   : > { %v248_v15 = vmul.f32 %v246_v14, %v246_v14 }
  0xfd   : > { %251 = vadd.xlane.f32.xlu1 %v248_v15 }
 0x182   : > { %v250_v16 = vpop.xlane.xlu1 %249 }
 0x183   : > { %v253_v17 = vmul.f32 0.007874016, %v250_v16 }
 0x185   : > { %519 = vrsqrt.f32 %v253_v17  ;;  %vm257_vm6 = vcmp.eq.f32.partialorder %v253_v17, inf  ;;  %v260_v22 = vand.u32 2147483648, %v253_v17  ;;  %vm259_vm7 = vcmp.eq.f32.partialorder %v253_v17, 0.0 }
 0x186   : > { %v252_v18 = vpop.xlane.xlu1 %251 }
 0x187   : > { %v254_v19 = vmul.f32 0.007874016, %v252_v18 }
 0x189   : > { %521 = vrsqrt.f32 %v254_v19  ;;  %vm264_vm8 = vcmp.eq.f32.partialorder %v254_v19, inf  ;;  %v267_v28 = vand.u32 2147483648, %v254_v19  ;;  %vm266_vm9 = vcmp.eq.f32.partialorder %v254_v19, 0.0 }
 0x192   : > { %v520_v20 = vpop.eup %519 }
 0x193   : > { %v256_v21 = vmul.f32 %v520_v20, %v253_v17 }
 0x195   : > { %v258_v23 = vsel %vm257_vm6, %v253_v17, %v256_v21 }
 0x196   : > { %v522_v24 = vpop.eup %521  ;;  %v261_v25 = vsel %vm259_vm7, %v260_v22, %v258_v23 }
 0x197   : > { %v269_v26 = vadd.f32 1e-12, %v261_v25  ;;  %v263_v27 = vmul.f32 %v522_v24, %v254_v19 }
 0x199   : > { %523 = vrcp.f32 %v269_v26  ;;  %v265_v29 = vsel %vm264_vm8, %v254_v19, %v263_v27 }
 0x19a   : > { %v268_v30 = vsel %vm266_vm9, %v267_v28, %v265_v29 }
 0x19b   : > { %v270_v31 = vadd.f32 1e-12, %v268_v30 }
 0x19d   : > { %525 = vrcp.f32 %v270_v31 }
 0x1a6   : > { %v524_v32 = vpop.eup %523 }
 0x1a7   : > { %v272_v33 = vmul.f32 0.5, %v524_v32 }
 0x1a9   : > { %v275_v34 = vmul.f32 %v272_v33, %v245_v10 }
 0x1aa   : > { %v526_v35 = vpop.eup %525 }
 0x1ab   : > { %277 = vmax.xlane.f32.xlu0 %v275_v34  ;;  %v274_v36 = vmul.f32 0.5, %v526_v35 }
 0x1ad   : > { %v276_v37 = vmul.f32 %v274_v36, %v246_v14 }
 0x1af   : > { %279 = vmax.xlane.f32.xlu1 %v276_v37 }
 0x234   : > { %v278_v38 = vpop.xlane.xlu0 %277 }
 0x235   : > { %v281_v39 = vsub.f32 %v275_v34, %v278_v38 }
 0x237   : > { %v283_v40 = vmul.f32 1.442695, %v281_v39  ;;  %v301_v47 = vmul.f32 %v295_v46, %v281_v39 }
 0x238   : > { %v280_v41 = vpop.xlane.xlu1 %279 }
 0x239   : > { %527 = vpow2.f32 %v283_v40  ;;  %v282_v42 = vsub.f32 %v276_v37, %v280_v41 }
 0x23b   : > { %v285_v43 = vmul.f32 1.442695, %v282_v42  ;;  %v302_v49 = vmul.f32 %v296_v48, %v282_v42 }
 0x23d   : > { %529 = vpow2.f32 %v285_v43 }
 0x246   : > { %v528_v44 = vpop.eup %527 }
 0x247   : > { %287 = vadd.xlane.f32.xlu0 %v528_v44 }
 0x24a   : > { %v530_v45 = vpop.eup %529 }
 0x24b   : > { %289 = vadd.xlane.f32.xlu1 %v530_v45  ;;  %297 = vadd.xlane.f32.xlu0 %v295_v46 }
 0x24f   : > { %299 = vadd.xlane.f32.xlu1 %v296_v48  ;;  %303 = vadd.xlane.f32.xlu0 %v301_v47 }
 0x253   : > { %305 = vadd.xlane.f32.xlu1 %v302_v49 }
 0x2d0   : > { %v288_v50 = vpop.xlane.xlu0 %287 }
 0x2d1   : > { %531 = vlog2.f32 %v288_v50 }
 0x2d4   : > { %v290_v51 = vpop.xlane.xlu1 %289  ;;  %v298_v53 = vpop.xlane.xlu0 %297 }
 0x2d5   : > { %533 = vlog2.f32 %v290_v51 }
 0x2d8   : > { %v300_v59 = vpop.xlane.xlu1 %299  ;;  %v304_v63 = vpop.xlane.xlu0 %303 }
 0x2dc   : > { %v306_v4 = vpop.xlane.xlu1 %305 }
 0x2de   : > { %v532_v56 = vpop.eup %531 }
 0x2df   : > { %v292_v58 = vmul.f32 0.6931472, %v532_v56 }
 0x2e1   : > { %v307_v61 = vmul.f32 %v298_v53, %v292_v58 }
 0x2e2   : > { %v534_v62 = vpop.eup %533 }
 0x2e3   : > { %v294_v1 = vmul.f32 0.6931472, %v534_v62  ;;  %v309_v2 = vsub.f32 %v307_v61, %v304_v63 }
 0x2e5   : > { %v308_v3 = vmul.f32 %v300_v59, %v294_v1  ;;  %v320_v5 = vsel %vm318_vm10, %v309_v2, 0.0 }
 0x2e6   : > { %v323_v8 = vsel %vm322_vm12, %v320_v5, 0.0 }
 0x2e7   : > { %v310_v6 = vsub.f32 %v308_v3, %v306_v4 }
 0x2e9   : > { %v321_v7 = vsel %vm319_vm11, %v310_v6, 0.0 }
 0x2ea   : > { %v324_v9 = vsel %vm322_vm12, %v321_v7, 0.0 }
 0x2eb   : > { %v325_v10 = vadd.f32 %v324_v9, %v323_v8 }
 0x2ed   : > { %326 = vadd.xlane.f32.xlu0 %v325_v10 }
 0x376   : > { %v327_v11 = vpop.xlane.xlu0 %326 }
 0x377   : > { %v328_v12 = vrot.slane %v327_v11, 4 }
 0x379   : > { %v329_v13 = vadd.f32 %v328_v12, %v327_v11 }
 0x37b   : > { %v330_v14 = vrot.slane %v329_v13, 2 }
 0x37d   : > { %v331_v15 = vadd.f32 %v330_v14, %v329_v13 }
 0x37f   : > { %v332_v16 = vrot.slane %v331_v15, 1 }
 0x381   : > { %v333_v17 = vadd.f32 %v332_v16, %v331_v15 }
 0x383   : > { %472 = vpush %v333_v17 }
 0x3b4   : > { %s473_s4 = spop %472 }
 0x3b5   : > { %v335_v18 = vstv %s473_s4 }
 0x3b6   : > { %336 = vst [vmem:[%s213_s25] sm:$0xff] %v335_v18 }
 0x3b7   : > { %600 = shalt.err (!%p597_p3)
}
 0x3b8   : > { %s601_s6 = scalar_lea.hbm %s349_s14, 128  ;;  %s605_s28 = scalar_lea.hbm %s889_s2, 256 }
 0x3b9   : > { %p602_p9 = scmp.ne.s32.totalorder %s349_s14, %s601_s6  ;;  %p606_p13 = scmp.lt.s32.totalorder %s349_s14, %s889_s2 }
 0x3ba   : > { %p607_p2 = scmp.lt.s32.totalorder %s605_s28, %s601_s6 }
 0x3bb   : > { %p603_p10 = pnand %p602_p9, %p896_p5 }
 0x3bc   : > { %p608_p4 = por %p607_p2, %p606_p13 }
 0x3bd   : > { %p604_p11 = pneg %p603_p10 }
 0x3bf   : > { %p609_p6 = pnand %p608_p4, %p604_p11 }
 0x3c1   : > { %612 = shalt.err (!%p609_p6)
}
 0x3c2   : > { %476 = dma.vmem_to_hbm [thread:$0]  (%p896_p5), %s847_s30, 128, %s349_s14, %s338_s16  }
 0x3c3 PF: > { %s363_s20 = sand.u32 1, %s643_s9   ;;  %p897_p7 = scmp.ne.s32.totalorder %s895_s22, 0 }
 0x3c4   : > { %p898_p8 = scmp.ge.s32.totalorder %s655_s12, 2  ;;  %s364_s7 = scalar_lea.sflag [#allocation4], %s363_s20 }
 0x3c6   : > { %p479_p12 = pnand %p898_p8, %p897_p7 }
 0x3c8   : > { %p480_p0 = pneg %p479_p12 }
 0x3ca   : > { %638 = dma.done.wait (%p480_p0), %s364_s7, 128  }
 0x3cb   : > { %640 = vsyncadd (%p480_p0), %s364_s7, 4294967168  ;;  %p18_p1 = scmp.ge.s32.totalorder %s704_s15, 4   ;;  %s899_s9 = smov %s647_s10 }
 0x3cc   : > { %s900_s10 = smov %s651_s11  ;;  %s901_s11 = smov %s716_s18 }
 0x3cd   : > { %s902_s12 = smov %s704_s15  ;;  %20 = sbr.rel (!%p18_p1) target bundleno = 7 (0x7), region = 86 }
 0x3d2   :  { %369 = vsyncpa [#allocation3], 1 }
 0x3d3   :  { %371 = vsyncpa [#allocation3 + $0x1], 1 }
 0x3d4   :  { %372 = vsyncpa [#allocation6], 1 }
 0x3d5   :  { %374 = vsyncpa [#allocation6 + $0x1], 1 }
 0x3d6   :  { %375 = vsyncpa [#allocation4], 1 }
 0x3d7   :  { %377 = vsyncpa [#allocation4 + $0x1], 1 }

</bundles_post_ra>
